<compile_context>
chip_gen: v7x
topology: tpu7x:2x2x1
jax: 0.10.0
libtpu: 0.0.40
codegen_flags: <defaults>
</compile_context>

<pallas_src>
import functools

import jax
import jax.numpy as jnp
from jax.experimental import pallas as pl
from jax.experimental.pallas import tpu as pltpu

BN_EPS = 1e-5            # PyTorch BatchNorm1d default eps
LN_EPS = 1e-6            # nn.LayerNorm(embed_dim, eps=1e-06)
INV_SQRT2 = 0.7071067811865476


def linea_embedding_kernel(x_ref, w_ref, b_ref, ln_g_ref, ln_b_ref, p_ref, o_ref):
    # x_ref:   (tmg, g*R)   bf16/f32   -- g tokens packed per lane-row
    # w_ref:   (g*R, g*E)   f32        -- kron(I_g, W') with BN folded into W'
    # b_ref / ln_g_ref / ln_b_ref: (1, g*E) f32 -- per-token params tiled g times
    # p_ref:   (g*E, g*E)   f32        -- kron(I_g, ones(E,E)/E): per-token group mean
    # o_ref:   (tmg, g*E)   bf16/f32
    x = x_ref[...].astype(jnp.float32)

    # Linear (BN already folded into the weights). Block-diagonal weight keeps the
    # 8-tokens-per-row packing intact: row r of h holds 8 consecutive token embeddings.
    h = jnp.dot(x, w_ref[...], preferred_element_type=jnp.float32) + b_ref[...]

    # LayerNorm over embed_dim, done per 32-lane token group via the group-averaging
    # matrix P (MXU is idle here; this avoids any in-kernel reshape / cross-lane op).
    mu = jnp.dot(h, p_ref[...], preferred_element_type=jnp.float32)
    c = h - mu
    var = jnp.dot(c * c, p_ref[...], preferred_element_type=jnp.float32)
    hn = c * jax.lax.rsqrt(var + LN_EPS)
    hn = hn * ln_g_ref[...] + ln_b_ref[...]

    # GELU (exact erf form, PyTorch default). Kernel is HBM-bound, so the VPU erf
    # polynomial is hidden under DMA; tanh/EUP variant not needed.
    out = 0.5 * hn * (1.0 + jax.lax.erf(hn * INV_SQRT2))

    # Dropout: identity in eval mode.
    o_ref[...] = out.astype(o_ref.dtype)


def _choose_group(R, E):
    """Tokens packed per lane-row so the input row is 128 lanes wide."""
    if R >= 128 or 128 % R != 0:
        return 1                      # fall back to one token per row (still correct)
    g = 128 // R
    # Keep the (g*E, g*E) group-mean matrix small if embed_dim is large.
    while g > 1 and g * E > 1024:
        g //= 2
    return max(g, 1)


def linea_embedding(x, params, *, tile_rows=512, io_dtype=jnp.bfloat16):
    """x: (B, T, n_regions) -> (B, T, embed_dim) in io_dtype (eval-mode forward)."""
    B, T, R = x.shape
    E = params["fc_w"].shape[1]
    M = B * T
    g = _choose_group(R, E)

    # ---- Fold eval-mode BatchNorm1d into the Linear: W' = scale*W, b' = shift@W + b.
    scale = params["bn_gamma"] * jax.lax.rsqrt(params["bn_var"] + BN_EPS)
    shift = params["bn_beta"] - params["bn_mean"] * scale
    w_fold = (scale[:, None] * params["fc_w"]).astype(jnp.float32)          # (R, E)
    b_fold = (params["fc_b"] + shift @ params["fc_w"]).astype(jnp.float32)  # (E,)

    # ---- Lane-dense packed operands (built once in the wrapper, tiny).
    eye_g = jnp.eye(g, dtype=jnp.float32)
    w_blk = jnp.kron(eye_g, w_fold)                                   # (g*R, g*E)
    p_grp = jnp.kron(eye_g, jnp.full((E, E), 1.0 / E, jnp.float32))   # (g*E, g*E)
    b_t = jnp.tile(b_fold, g).reshape(1, g * E)
    ln_g_t = jnp.tile(params["ln_g"].astype(jnp.float32), g).reshape(1, g * E)
    ln_b_t = jnp.tile(params["ln_b"].astype(jnp.float32), g).reshape(1, g * E)

    # ---- Pack g consecutive tokens per row (contiguous row-major reinterpretation),
    #      pad the row axis so it tiles cleanly (handles arbitrary B*T).
    Mg = pl.cdiv(M, g)                       # lane-rows needed
    tmg = Mg if Mg <= tile_rows else tile_rows
    Mg_pad = pl.cdiv(Mg, tmg) * tmg
    M_pad = Mg_pad * g

    x2 = x.reshape(M, R).astype(io_dtype)
    if M_pad != M:
        x2 = jnp.pad(x2, ((0, M_pad - M), (0, 0)))
    xg = x2.reshape(Mg_pad, g * R)

    grid = (Mg_pad // tmg,)
    out = pl.pallas_call(
        linea_embedding_kernel,
        out_shape=jax.ShapeDtypeStruct((Mg_pad, g * E), io_dtype),
        grid_spec=pltpu.PrefetchScalarGridSpec(
            num_scalar_prefetch=0,
            grid=grid,
            in_specs=[
                pl.BlockSpec((tmg, g * R), lambda i: (i, 0)),      # packed x tile
                pl.BlockSpec((g * R, g * E), lambda i: (0, 0)),    # block-diag weight
                pl.BlockSpec((1, g * E), lambda i: (0, 0)),        # bias (tiled)
                pl.BlockSpec((1, g * E), lambda i: (0, 0)),        # LN gamma (tiled)
                pl.BlockSpec((1, g * E), lambda i: (0, 0)),        # LN beta (tiled)
                pl.BlockSpec((g * E, g * E), lambda i: (0, 0)),    # group-mean matrix
            ],
            out_specs=pl.BlockSpec((tmg, g * E), lambda i: (i, 0)),
        ),
        compiler_params=pltpu.CompilerParams(
            dimension_semantics=("parallel",)),    # row tiles shard across v7x's 2 TCs
    )(xg, w_blk, b_t, ln_g_t, ln_b_t, p_grp)

    # Un-pack: (Mg_pad, g*E) row-major == (M_pad, E) row-major; drop padding rows.
    out = out.reshape(M_pad, E)[:M].reshape(B, T, E)
    return out


def make_params(key, n_regions, embed_dim):
    """Deterministic synthetic parameters matching the module's __init__ shapes."""
    ks = jax.random.split(key, 8)
    k_fc = 1.0 / jnp.sqrt(jnp.float32(n_regions))
    # nn.Linear(n_regions, embed_dim): weight (E, R) -> stored transposed (R, E)
    fc_w = jax.random.uniform(ks[0], (n_regions, embed_dim), jnp.float32, -k_fc, k_fc)
    fc_b = jax.random.uniform(ks[1], (embed_dim,), jnp.float32, -k_fc, k_fc)
    # LayerNorm(embed_dim)
    ln_g = 1.0 + 0.1 * jax.random.normal(ks[2], (embed_dim,), jnp.float32)
    ln_b = 0.1 * jax.random.normal(ks[3], (embed_dim,), jnp.float32)
    # BatchNorm1d(n_regions): weight, bias, running_mean, running_var (pretend trained)
    bn_gamma = 1.0 + 0.1 * jax.random.normal(ks[4], (n_regions,), jnp.float32)
    bn_beta = 0.1 * jax.random.normal(ks[5], (n_regions,), jnp.float32)
    bn_mean = 0.1 * jax.random.normal(ks[6], (n_regions,), jnp.float32)
    bn_var = 0.5 + jax.random.uniform(ks[7], (n_regions,), jnp.float32, 0.0, 1.0)
    return dict(fc_w=fc_w, fc_b=fc_b, ln_g=ln_g, ln_b=ln_b,
                bn_gamma=bn_gamma, bn_beta=bn_beta, bn_mean=bn_mean, bn_var=bn_var)


def reference(x, p):
    """Pure-JAX reference mirroring eval-mode PyTorch forward (f32)."""
    xb = (x - p["bn_mean"]) * jax.lax.rsqrt(p["bn_var"] + BN_EPS) * p["bn_gamma"] + p["bn_beta"]
    h = xb @ p["fc_w"] + p["fc_b"]
    mu = jnp.mean(h, axis=-1, keepdims=True)
    var = jnp.mean(jnp.square(h - mu), axis=-1, keepdims=True)
    hn = (h - mu) * jax.lax.rsqrt(var + LN_EPS) * p["ln_g"] + p["ln_b"]
    return 0.5 * hn * (1.0 + jax.lax.erf(hn * INV_SQRT2))


if __name__ == "__main__":
    B, T, R, E = 2, 8, 16, 32          # batch, seq, n_regions, embed_dim
    key = jax.random.PRNGKey(0)
    kx, kp = jax.random.split(key)
    x = jax.random.normal(kx, (B, T, R), jnp.float32)
    params = make_params(kp, R, E)
    ref = reference(x, params)

    # Default perf configuration: bf16 HBM I/O, f32 compute inside the kernel.
    out_bf16 = jax.block_until_ready(linea_embedding(x, params))
    assert out_bf16.shape == (B, T, E)
    assert jnp.allclose(out_bf16.astype(jnp.float32), ref, atol=5e-2, rtol=5e-2), \
        "bf16-I/O kernel mismatch vs reference"

    # Strict numerical check with f32 I/O (same kernel, same packing).
    out_f32 = jax.block_until_ready(linea_embedding(x, params, io_dtype=jnp.float32))
    assert jnp.allclose(out_f32, ref, atol=1e-3, rtol=1e-3), \
        "f32-I/O kernel mismatch vs reference"

    # Ragged token count (B*T not a multiple of the token group) exercises padding.
    x_r = jax.random.normal(jax.random.PRNGKey(1), (3, 5, R), jnp.float32)
    out_r = jax.block_until_ready(linea_embedding(x_r, params, io_dtype=jnp.float32))
    assert jnp.allclose(out_r, reference(x_r, params), atol=1e-3, rtol=1e-3), \
        "padded/ragged kernel mismatch vs reference"

    # TODO(synk): Dropout and BatchNorm training-mode batch statistics are not
    # implemented (eval-mode forward only, matching module.eval()).
    print("KERNEL_OK")
</pallas_src>

<mosaic_0001>
module attributes {stable_mosaic.version = 11 : i64} {
  func.func @linea_embedding_kernel(%arg0: i32, %arg1: memref<2x128xbf16, #tpu.memory_space<vmem>>, %arg2: memref<128x256xf32, #tpu.memory_space<vmem>>, %arg3: memref<1x256xf32, #tpu.memory_space<vmem>>, %arg4: memref<1x256xf32, #tpu.memory_space<vmem>>, %arg5: memref<1x256xf32, #tpu.memory_space<vmem>>, %arg6: memref<256x256xf32, #tpu.memory_space<vmem>>, %arg7: memref<2x256xbf16, #tpu.memory_space<vmem>>) attributes {dimension_semantics = [#tpu.dimension_semantics<parallel>], iteration_bounds = array<i64: 1>, scalar_prefetch = 0 : i64, scratch_operands = 0 : i64, tpu.core_type = #tpu.core_type<tc>, window_params = [{transform_indices = @transform_0, window_bounds = array<i64: 2, 128>}, {pipeline_mode = #tpu.pipeline_mode<synchronous>, transform_indices = @transform_1, window_bounds = array<i64: 128, 256>}, {pipeline_mode = #tpu.pipeline_mode<synchronous>, transform_indices = @transform_2, window_bounds = array<i64: 1, 256>}, {pipeline_mode = #tpu.pipeline_mode<synchronous>, transform_indices = @transform_3, window_bounds = array<i64: 1, 256>}, {pipeline_mode = #tpu.pipeline_mode<synchronous>, transform_indices = @transform_4, window_bounds = array<i64: 1, 256>}, {pipeline_mode = #tpu.pipeline_mode<synchronous>, transform_indices = @transform_5, window_bounds = array<i64: 256, 256>}, {transform_indices = @transform_6, window_bounds = array<i64: 2, 256>}]} {
    %c0 = arith.constant 0 : index
    %c0_0 = arith.constant 0 : index
    %0 = vector.load %arg1[%c0, %c0_0] : memref<2x128xbf16, #tpu.memory_space<vmem>>, vector<2x128xbf16>
    %1 = arith.extf %0 : vector<2x128xbf16> to vector<2x128xf32>
    %c0_1 = arith.constant 0 : index
    %c0_2 = arith.constant 0 : index
    %2 = vector.load %arg2[%c0_1, %c0_2] : memref<128x256xf32, #tpu.memory_space<vmem>>, vector<128x256xf32>
    %cst = arith.constant dense<0.000000e+00> : vector<2x256xf32>
    %3 = tpu.matmul %1, %2, %cst {dimension_numbers = #tpu.dot_dimension_numbers<[1], [0], [0], [1], [0, 0, 1, 1], [], []>} : vector<2x128xf32>, vector<128x256xf32>, vector<2x256xf32> -> vector<2x256xf32>
    %c0_3 = arith.constant 0 : index
    %c0_4 = arith.constant 0 : index
    %4 = vector.load %arg3[%c0_3, %c0_4] : memref<1x256xf32, #tpu.memory_space<vmem>>, vector<1x256xf32>
    %5 = vector.broadcast %4 : vector<1x256xf32> to vector<2x256xf32>
    %6 = arith.addf %3, %5 : vector<2x256xf32>
    %c0_5 = arith.constant 0 : index
    %c0_6 = arith.constant 0 : index
    %7 = vector.load %arg6[%c0_5, %c0_6] : memref<256x256xf32, #tpu.memory_space<vmem>>, vector<256x256xf32>
    %cst_7 = arith.constant dense<0.000000e+00> : vector<2x256xf32>
    %8 = tpu.matmul %6, %7, %cst_7 {dimension_numbers = #tpu.dot_dimension_numbers<[1], [0], [0], [1], [0, 0, 1, 1], [], []>} : vector<2x256xf32>, vector<256x256xf32>, vector<2x256xf32> -> vector<2x256xf32>
    %9 = arith.subf %6, %8 : vector<2x256xf32>
    %10 = arith.mulf %9, %9 : vector<2x256xf32>
    %c0_8 = arith.constant 0 : index
    %c0_9 = arith.constant 0 : index
    %11 = vector.load %arg6[%c0_8, %c0_9] : memref<256x256xf32, #tpu.memory_space<vmem>>, vector<256x256xf32>
    %cst_10 = arith.constant dense<0.000000e+00> : vector<2x256xf32>
    %12 = tpu.matmul %10, %11, %cst_10 {dimension_numbers = #tpu.dot_dimension_numbers<[1], [0], [0], [1], [0, 0, 1, 1], [], []>} : vector<2x256xf32>, vector<256x256xf32>, vector<2x256xf32> -> vector<2x256xf32>
    %cst_11 = arith.constant 9.99999997E-7 : f32
    %13 = vector.broadcast %cst_11 : f32 to vector<2x256xf32>
    %14 = arith.addf %12, %13 : vector<2x256xf32>
    %15 = math.rsqrt %14 : vector<2x256xf32>
    %16 = arith.mulf %9, %15 : vector<2x256xf32>
    %c0_12 = arith.constant 0 : index
    %c0_13 = arith.constant 0 : index
    %17 = vector.load %arg4[%c0_12, %c0_13] : memref<1x256xf32, #tpu.memory_space<vmem>>, vector<1x256xf32>
    %18 = vector.broadcast %17 : vector<1x256xf32> to vector<2x256xf32>
    %19 = arith.mulf %16, %18 : vector<2x256xf32>
    %c0_14 = arith.constant 0 : index
    %c0_15 = arith.constant 0 : index
    %20 = vector.load %arg5[%c0_14, %c0_15] : memref<1x256xf32, #tpu.memory_space<vmem>>, vector<1x256xf32>
    %21 = vector.broadcast %20 : vector<1x256xf32> to vector<2x256xf32>
    %22 = arith.addf %19, %21 : vector<2x256xf32>
    %cst_16 = arith.constant 5.000000e-01 : f32
    %23 = vector.broadcast %cst_16 : f32 to vector<2x256xf32>
    %24 = arith.mulf %23, %22 : vector<2x256xf32>
    %cst_17 = arith.constant 0.707106769 : f32
    %25 = vector.broadcast %cst_17 : f32 to vector<2x256xf32>
    %26 = arith.mulf %22, %25 : vector<2x256xf32>
    %27 = math.erf %26 : vector<2x256xf32>
    %cst_18 = arith.constant 1.000000e+00 : f32
    %28 = vector.broadcast %cst_18 : f32 to vector<2x256xf32>
    %29 = arith.addf %28, %27 : vector<2x256xf32>
    %30 = arith.mulf %24, %29 : vector<2x256xf32>
    %31 = arith.truncf %30 : vector<2x256xf32> to vector<2x256xbf16>
    %c0_19 = arith.constant 0 : index
    %c0_20 = arith.constant 0 : index
    %32 = vector.load %arg7[%c0_19, %c0_20] : memref<2x256xbf16, #tpu.memory_space<vmem>>, vector<2x256xbf16>
    tpu.vector_store %arg7[%c0_19, %c0_20], %31 {strides = array<i32>} : memref<2x256xbf16, #tpu.memory_space<vmem>>, vector<2x256xbf16>,
    return
  }
  func.func @transform_0(%arg0: i32) -> (i32, i32) {
    %c0_i32 = arith.constant 0 : i32
    %c0_i32_0 = arith.constant 0 : i32
    return %arg0, %c0_i32 : i32, i32
  }
  func.func @transform_1(%arg0: i32) -> (i32, i32) {
    %c0_i32 = arith.constant 0 : i32
    %c0_i32_0 = arith.constant 0 : i32
    %c0_i32_1 = arith.constant 0 : i32
    return %c0_i32, %c0_i32_0 : i32, i32
  }
  func.func @transform_2(%arg0: i32) -> (i32, i32) {
    %c0_i32 = arith.constant 0 : i32
    %c0_i32_0 = arith.constant 0 : i32
    %c0_i32_1 = arith.constant 0 : i32
    return %c0_i32, %c0_i32_0 : i32, i32
  }
  func.func @transform_3(%arg0: i32) -> (i32, i32) {
    %c0_i32 = arith.constant 0 : i32
    %c0_i32_0 = arith.constant 0 : i32
    %c0_i32_1 = arith.constant 0 : i32
    return %c0_i32, %c0_i32_0 : i32, i32
  }
  func.func @transform_4(%arg0: i32) -> (i32, i32) {
    %c0_i32 = arith.constant 0 : i32
    %c0_i32_0 = arith.constant 0 : i32
    %c0_i32_1 = arith.constant 0 : i32
    return %c0_i32, %c0_i32_0 : i32, i32
  }
  func.func @transform_5(%arg0: i32) -> (i32, i32) {
    %c0_i32 = arith.constant 0 : i32
    %c0_i32_0 = arith.constant 0 : i32
    %c0_i32_1 = arith.constant 0 : i32
    return %c0_i32, %c0_i32_0 : i32, i32
  }
  func.func @transform_6(%arg0: i32) -> (i32, i32) {
    %c0_i32 = arith.constant 0 : i32
    %c0_i32_0 = arith.constant 0 : i32
    return %arg0, %c0_i32 : i32, i32
  }
}

</mosaic_0001>

<bundles_post_ra>
// kernel: tpu_custom_call.1
= control target key start
LH: loop header
LB: loop body
LE: loop exit
PB: predicated region body
PF: predicated region fallthrough
CT: control target
= control target key end

     0   :  { %11 = vsyncpa [#allocation3], 0  ;;  %s915_s0 = inlined_call_operand.hbm [shape: bf16[2,128], index: 0, kind: input, shape index: {}]   ;;  %s916_s1 = inlined_call_operand.hbm [shape: f32[128,256], index: 1, kind: input, shape index: {}]   ;;  %s917_s2 = inlined_call_operand.vmem [shape: f32[1,256], index: 2, kind: input, shape index: {}]   ;;  %s918_s3 = inlined_call_operand.vmem [shape: f32[1,256], index: 3, kind: input, shape index: {}]   ;;  %s919_s4 = inlined_call_operand.vmem [shape: f32[1,256], index: 4, kind: input, shape index: {}]   ;;  %s920_s5 = inlined_call_operand.hbm [shape: f32[256,256], index: 5, kind: input, shape index: {}]   ;;  %s921_s6 = inlined_call_operand.hbm [shape: bf16[2,256], index: 6, kind: output, shape index: {}]  }
   0x1   :  { %12 = vsyncpa [#allocation6], 0 }
   0x2   :  { %13 = vsyncpa [#allocation4], 0  ;;  %s741_s21 = smov [#allocation5]   ;;  %s647_s25 = scalar_lea.hbm %s916_s1, 4096 }
   0x3   :  { %s29_s22 = sshll.u32 %s741_s21, 4  ;;  %p648_p0 = scmp.ne.s32.totalorder %s916_s1, %s647_s25  ;;  %s30_s22 = int_to_ptr.vmem [resolvable:$true] %s29_s22 }
   0x4   :  { %p651_p1 = scmp.lt.u32.totalorder %s647_s25, %s916_s1 }
   0x6   :  { %p653_p2 = pnand %p651_p1, %p648_p0 }
   0x8   :  { %656 = shalt.err (!%p653_p2)
}
   0x9   :  { %s657_s30 = scalar_lea.vmem %s30_s22, 4096  ;;  %p662_p4 = scmp.lt.s32.totalorder %s30_s22, %s30_s22 }
   0xa   :  { %p658_p3 = scmp.ne.s32.totalorder %s30_s22, %s657_s30  ;;  %p663_p5 = scmp.lt.s32.totalorder %s657_s30, %s657_s30 }
   0xc   :  { %p664_p6 = por %p663_p5, %p662_p4 }
   0xe   :  { %p665_p7 = pnand %p664_p6, %p658_p3 }
  0x10   :  { %668 = shalt.err (!%p665_p7)
}
  0x11   :  { %s742_s7 = smov 256   ;;  %s743_s8 = smov 16  }
  0x12   :  { %35 = dma.hbm_to_vmem [thread:$0]  %s916_s1, 4096, %s30_s22, [#allocation6], %s742_s7, %s742_s7, %s743_s8  }
  0x13   :  { %s744_s11 = smov [#allocation2]   ;;  %s745_s13 = smov [#allocation7]  }
  0x14   :  { %s20_s12 = sshll.u32 %s744_s11, 4  ;;  %s47_s14 = sshll.u32 %s745_s13, 4  ;;  %s21_s12 = int_to_ptr.vmem [resolvable:$true] %s20_s12  ;;  %s48_s14 = int_to_ptr.vmem [resolvable:$true] %s47_s14 }
  0x15   :  { %s669_s17 = scalar_lea.hbm %s915_s0, 16 }
  0x16   :  { %p670_p8 = scmp.ne.s32.totalorder %s915_s0, %s669_s17  ;;  %p673_p9 = scmp.lt.u32.totalorder %s669_s17, %s915_s0 }
  0x18   :  { %p675_p10 = pnand %p673_p9, %p670_p8 }
  0x1a   :  { %678 = shalt.err (!%p675_p10)
}
  0x1b   :  { %s679_s1 = scalar_lea.vmem %s21_s12, 16  ;;  %s683_s22 = scalar_lea.vmem %s21_s12, 32 }
  0x1c   :  { %p680_p11 = scmp.ne.s32.totalorder %s21_s12, %s679_s1  ;;  %p684_p12 = scmp.lt.s32.totalorder %s21_s12, %s21_s12 }
  0x1d   :  { %p685_p13 = scmp.lt.s32.totalorder %s683_s22, %s679_s1 }
  0x1f   :  { %p686_p0 = por %p685_p13, %p684_p12 }
  0x21   :  { %p687_p1 = pnand %p686_p0, %p680_p11 }
  0x23   :  { %690 = shalt.err (!%p687_p1)
}
  0x24   :  { %23 = dma.hbm_to_vmem [thread:$0]  %s915_s0, 16, %s21_s12, [#allocation3]  }
  0x25   :  { %s691_s27 = scalar_lea.hbm %s920_s5, 8192 }
  0x26   :  { %p692_p2 = scmp.ne.s32.totalorder %s920_s5, %s691_s27  ;;  %p695_p3 = scmp.lt.u32.totalorder %s691_s27, %s920_s5 }
  0x28   :  { %p697_p4 = pnand %p695_p3, %p692_p2 }
  0x2a   :  { %700 = shalt.err (!%p697_p4)
}
  0x2b   :  { %s701_s10 = scalar_lea.vmem %s48_s14, 8192  ;;  %p706_p6 = scmp.lt.s32.totalorder %s48_s14, %s48_s14 }
  0x2c   :  { %p702_p5 = scmp.ne.s32.totalorder %s48_s14, %s701_s10  ;;  %p707_p7 = scmp.lt.s32.totalorder %s701_s10, %s701_s10 }
  0x2e   :  { %p708_p8 = por %p707_p7, %p706_p6 }
  0x30   :  { %p709_p9 = pnand %p708_p8, %p702_p5 }
  0x32   :  { %712 = shalt.err (!%p709_p9)
}
  0x33   :  { %53 = dma.hbm_to_vmem [thread:$0]  %s920_s5, 8192, %s48_s14, [#allocation6], %s742_s7, %s742_s7, %s743_s8  }
  0x34   :  { %735 = dma.done.wait [#allocation3], 16  }
  0x35   :  { %736 = vsyncadd [#allocation3], 4294967280 }
  0x36   :  { %737 = dma.done.wait [#allocation6], 12288  }
  0x37   :  { %738 = vsyncadd [#allocation6], 4294955008  ;;  %v746_v0 = vmov 0.0   ;;  %v66_v1 = vld [vmem:[#allocation5 + $0x8] sm:$0xff]  ;;  %v68_v2 = vld [vmem:[#allocation5 + $0x18] sm:$0xff] }
  0x38   :  { %173 = vmatprep.mubr.f32.mxu0 %v746_v0  ;;  %v65_v3 = vld [vmem:[#allocation5] sm:$0xff]  ;;  %v471_v4 = vpack.c.bf16 %v68_v2, %v66_v1  ;;  %v67_v5 = vld [vmem:[#allocation5 + $0x10] sm:$0xff]  ;;  %v70_v6 = vld [vmem:[#allocation5 + $0x28] sm:$0xff] }
  0x39   :  { %v72_v7 = vld [vmem:[#allocation5 + $0x38] sm:$0xff]  ;;  %v473_v8 = vpack.c.bf16 %v67_v5, %v65_v3  ;;  %v69_v10 = vld [vmem:[#allocation5 + $0x20] sm:$0xff]  ;;  %v71_v11 = vld [vmem:[#allocation5 + $0x30] sm:$0xff] }
  0x3a   :  { %v475_v9 = vpack.c.bf16 %v72_v7, %v70_v6  ;;  %v74_v12 = vld [vmem:[#allocation5 + $0x48] sm:$0xff]  ;;  %472 = vmatprep.subr.bf16.mxu0 %v471_v4  ;;  %v76_v13 = vld [vmem:[#allocation5 + $0x58] sm:$0xff]  ;;  %v477_v14 = vpack.c.bf16 %v71_v11, %v69_v10  ;;  %v73_v16 = vld [vmem:[#allocation5 + $0x40] sm:$0xff] }
  0x3b   :  { %474 = vmatpush1.bf16.msra.mxu0 %v473_v8  ;;  %v479_v15 = vpack.c.bf16 %v76_v13, %v74_v12  ;;  %v75_v17 = vld [vmem:[#allocation5 + $0x50] sm:$0xff]  ;;  %v78_v18 = vld [vmem:[#allocation5 + $0x68] sm:$0xff]  ;;  %v80_v19 = vld [vmem:[#allocation5 + $0x78] sm:$0xff] }
  0x3c   :  { %476 = vmatprep.subr.bf16.mxu0 %v475_v9  ;;  %v481_v20 = vpack.c.bf16 %v75_v17, %v73_v16  ;;  %v483_v21 = vpack.c.bf16 %v80_v19, %v78_v18  ;;  %v77_v22 = vld [vmem:[#allocation5 + $0x60] sm:$0xff]  ;;  %v79_v23 = vld [vmem:[#allocation5 + $0x70] sm:$0xff]  ;;  %v82_v24 = vld [vmem:[#allocation5 + $0x88] sm:$0xff] }
  0x3d   :  { %v84_v25 = vld [vmem:[#allocation5 + $0x98] sm:$0xff]  ;;  %v81_v26 = vld [vmem:[#allocation5 + $0x80] sm:$0xff]  ;;  %v83_v27 = vld [vmem:[#allocation5 + $0x90] sm:$0xff]  ;;  %v485_v31 = vpack.c.bf16 %v79_v23, %v77_v22 }
  0x3e   :  { %v181_v28 = vld [vmem:[#allocation7 + $0x8] sm:$0xff]  ;;  %v183_v29 = vld [vmem:[#allocation7 + $0x18] sm:$0xff]  ;;  %v180_v30 = vld [vmem:[#allocation7] sm:$0xff]  ;;  %v487_v36 = vpack.c.bf16 %v84_v25, %v82_v24  ;;  %v489_v46 = vpack.c.bf16 %v83_v27, %v81_v26 }
  0x3f   :  { %478 = vmatpush1.bf16.msra.mxu0 %v477_v14  ;;  %v826_v32 = vpack.c.bf16 %v183_v29, %v181_v28  ;;  %v182_v33 = vld [vmem:[#allocation7 + $0x10] sm:$0xff]  ;;  %v185_v34 = vld [vmem:[#allocation7 + $0x28] sm:$0xff]  ;;  %v187_v35 = vld [vmem:[#allocation7 + $0x38] sm:$0xff] }
  0x40   :  { %480 = vmatprep.subr.bf16.mxu0 %v479_v15  ;;  %v828_v37 = vpack.c.bf16 %v182_v33, %v180_v30  ;;  %v830_v38 = vpack.c.bf16 %v187_v35, %v185_v34  ;;  %v184_v39 = vld [vmem:[#allocation7 + $0x20] sm:$0xff]  ;;  %v186_v40 = vld [vmem:[#allocation7 + $0x30] sm:$0xff]  ;;  %v189_v41 = vld [vmem:[#allocation7 + $0x48] sm:$0xff] }
  0x41   :  { %v86_v42 = vld [vmem:[#allocation5 + $0xa8] sm:$0xff]  ;;  %v88_v43 = vld [vmem:[#allocation5 + $0xb8] sm:$0xff]  ;;  %504 = vmatprep.subr.bf16.mxu1 %v826_v32  ;;  %v834_v45 = vpack.c.bf16 %v186_v40, %v184_v39  ;;  %v85_v47 = vld [vmem:[#allocation5 + $0xa0] sm:$0xff] }
  0x42   :  { %v191_v44 = vld [vmem:[#allocation7 + $0x58] sm:$0xff]  ;;  %506 = vmatpush1.bf16.msra.mxu1 %v828_v37  ;;  %v188_v49 = vld [vmem:[#allocation7 + $0x40] sm:$0xff]  ;;  %v190_v50 = vld [vmem:[#allocation7 + $0x50] sm:$0xff]  ;;  %v491_v51 = vpack.c.bf16 %v88_v43, %v86_v42 }
  0x43   :  { %482 = vmatpush1.bf16.msra.mxu0 %v481_v20  ;;  %508 = vmatprep.subr.bf16.mxu1 %v830_v38  ;;  %v837_v48 = vpack.c.bf16 %v191_v44, %v189_v41  ;;  %v87_v52 = vld [vmem:[#allocation5 + $0xb0] sm:$0xff]  ;;  %v193_v53 = vld [vmem:[#allocation7 + $0x68] sm:$0xff]  ;;  %v195_v54 = vld [vmem:[#allocation7 + $0x78] sm:$0xff]  ;;  %v840_v57 = vpack.c.bf16 %v190_v50, %v188_v49 }
  0x44   :  { %484 = vmatprep.subr.bf16.mxu0 %v483_v21  ;;  %v90_v55 = vld [vmem:[#allocation5 + $0xc8] sm:$0xff]  ;;  %v92_v56 = vld [vmem:[#allocation5 + $0xd8] sm:$0xff]  ;;  %v493_v58 = vpack.c.bf16 %v87_v52, %v85_v47  ;;  %v89_v59 = vld [vmem:[#allocation5 + $0xc0] sm:$0xff]  ;;  %v843_v60 = vpack.c.bf16 %v195_v54, %v193_v53 }
  0x45   :  { %v192_v61 = vld [vmem:[#allocation7 + $0x60] sm:$0xff]  ;;  %v194_v62 = vld [vmem:[#allocation7 + $0x70] sm:$0xff]  ;;  %v495_v63 = vpack.c.bf16 %v92_v56, %v90_v55  ;;  %v197_v1 = vld [vmem:[#allocation7 + $0x88] sm:$0xff] }
  0x46   :  { %510 = vmatpush1.bf16.msra.mxu1 %v834_v45  ;;  %v91_v0 = vld [vmem:[#allocation5 + $0xd0] sm:$0xff]  ;;  %v199_v2 = vld [vmem:[#allocation7 + $0x98] sm:$0xff]  ;;  %v94_v3 = vld [vmem:[#allocation5 + $0xe8] sm:$0xff]  ;;  %v846_v5 = vpack.c.bf16 %v194_v62, %v192_v61 }
  0x47   :  { %486 = vmatpush1.bf16.msra.mxu0 %v485_v31  ;;  %512 = vmatprep.subr.bf16.mxu1 %v837_v48  ;;  %v96_v4 = vld [vmem:[#allocation5 + $0xf8] sm:$0xff]  ;;  %v497_v6 = vpack.c.bf16 %v91_v0, %v89_v59  ;;  %v93_v7 = vld [vmem:[#allocation5 + $0xe0] sm:$0xff]  ;;  %v849_v8 = vpack.c.bf16 %v199_v2, %v197_v1  ;;  %v198_v10 = vld [vmem:[#allocation7 + $0x90] sm:$0xff] }
  0x48   :  { %488 = vmatprep.subr.bf16.mxu0 %v487_v36  ;;  %v196_v9 = vld [vmem:[#allocation7 + $0x80] sm:$0xff]  ;;  %v499_v11 = vpack.c.bf16 %v96_v4, %v94_v3  ;;  %v95_v12 = vld [vmem:[#allocation5 + $0xf0] sm:$0xff]  ;;  %v201_v13 = vld [vmem:[#allocation7 + $0xa8] sm:$0xff] }
  0x49   :  { %v203_v14 = vld [vmem:[#allocation7 + $0xb8] sm:$0xff]  ;;  %v852_v15 = vpack.c.bf16 %v198_v10, %v196_v9  ;;  %v501_v16 = vpack.c.bf16 %v95_v12, %v93_v7  ;;  %v200_v19 = vld [vmem:[#allocation7 + $0xa0] sm:$0xff]  ;;  %v202_v20 = vld [vmem:[#allocation7 + $0xb0] sm:$0xff] }
  0x4a   :  { %514 = vmatpush1.bf16.msra.mxu1 %v840_v57  ;;  %v63_v17 = vld [vmem:[#allocation2] sm:$0x1]  ;;  %v855_v18 = vpack.c.bf16 %v203_v14, %v201_v13  ;;  %v205_v21 = vld [vmem:[#allocation7 + $0xc8] sm:$0xff]  ;;  %v858_v24 = vpack.c.bf16 %v202_v20, %v200_v19  ;;  %v204_v26 = vld [vmem:[#allocation7 + $0xc0] sm:$0xff]  ;;  %v99_v19 = vlaneseq }
  0x4b   :  { %490 = vmatpush1.bf16.msra.mxu0 %v489_v46  ;;  %516 = vmatprep.subr.bf16.mxu1 %v843_v60  ;;  %v207_v22 = vld [vmem:[#allocation7 + $0xd8] sm:$0xff]  ;;  %v64_v23 = vunpack.c.l.bf16 %v63_v17  ;;  %v206_v27 = vld [vmem:[#allocation7 + $0xd0] sm:$0xff]  ;;  %v209_v28 = vld [vmem:[#allocation7 + $0xe8] sm:$0xff] }
  0x4c   :  { %492 = vmatprep.subr.bf16.mxu0 %v491_v51  ;;  %v861_v25 = vpack.c.bf16 %v207_v22, %v205_v21  ;;  %v211_v29 = vld [vmem:[#allocation7 + $0xf8] sm:$0xff]  ;;  %v865_v30 = vpack.c.bf16 %v206_v27, %v204_v26  ;;  %v208_v33 = vld [vmem:[#allocation7 + $0xe0] sm:$0xff]  ;;  %v210_v34 = vld [vmem:[#allocation7 + $0xf0] sm:$0xff]  ;;  %v100_v20 = vshrl.u32 %v99_v19, 7 }
  0x4d   :  { %v868_v31 = vpack.c.bf16 %v211_v29, %v209_v28  ;;  %v213_v35 = vld [vmem:[#allocation7 + $0x108] sm:$0xff]  ;;  %v215_v36 = vld [vmem:[#allocation7 + $0x118] sm:$0xff]  ;;  %v212_v40 = vld [vmem:[#allocation7 + $0x100] sm:$0xff] }
  0x4e   :  { %518 = vmatpush1.bf16.msra.mxu1 %v846_v5  ;;  %v876_v39 = vpack.c.bf16 %v215_v36, %v213_v35  ;;  %v214_v41 = vld [vmem:[#allocation7 + $0x110] sm:$0xff]  ;;  %v217_v42 = vld [vmem:[#allocation7 + $0x128] sm:$0xff]  ;;  %v219_v43 = vld [vmem:[#allocation7 + $0x138] sm:$0xff]  ;;  %v105_v21 = vsub.s32 1, %v100_v20 }
  0x4f   :  { %494 = vmatpush1.bf16.msra.mxu0 %v493_v58  ;;  %520 = vmatprep.subr.bf16.mxu1 %v849_v8  ;;  %v216_v44 = vld [vmem:[#allocation7 + $0x120] sm:$0xff]  ;;  %v218_v46 = vld [vmem:[#allocation7 + $0x130] sm:$0xff]  ;;  %v221_v47 = vld [vmem:[#allocation7 + $0x148] sm:$0xff] }
  0x50   :  { %496 = vmatprep.subr.bf16.mxu0 %v495_v63  ;;  %v223_v49 = vld [vmem:[#allocation7 + $0x158] sm:$0xff]  ;;  %v220_v51 = vld [vmem:[#allocation7 + $0x140] sm:$0xff]  ;;  %v225_v52 = vld [vmem:[#allocation7 + $0x168] sm:$0xff] }
  0x51   :  { %v543_v50 = vpack.c.bf16 %v223_v49, %v221_v47  ;;  %v227_v53 = vld [vmem:[#allocation7 + $0x178] sm:$0xff]  ;;  %v224_v56 = vld [vmem:[#allocation7 + $0x160] sm:$0xff]  ;;  %v229_v58 = vld [vmem:[#allocation7 + $0x188] sm:$0xff] }
  0x52   :  { %522 = vmatpush1.bf16.msra.mxu1 %v852_v15  ;;  %v547_v55 = vpack.c.bf16 %v227_v53, %v225_v52  ;;  %v231_v59 = vld [vmem:[#allocation7 + $0x198] sm:$0xff]  ;;  %v228_v62 = vld [vmem:[#allocation7 + $0x180] sm:$0xff]  ;;  %v230_v63 = vld [vmem:[#allocation7 + $0x190] sm:$0xff] }
  0x53   :  { %498 = vmatpush1.bf16.msra.mxu0 %v497_v6  ;;  %524 = vmatprep.subr.bf16.mxu1 %v855_v18  ;;  %v551_v61 = vpack.c.bf16 %v231_v59, %v229_v58  ;;  %v233_v0 = vld [vmem:[#allocation7 + $0x1a8] sm:$0xff]  ;;  %v235_v1 = vld [vmem:[#allocation7 + $0x1b8] sm:$0xff]  ;;  %v553_v2 = vpack.c.bf16 %v230_v63, %v228_v62  ;;  %v232_v4 = vld [vmem:[#allocation7 + $0x1a0] sm:$0xff] }
  0x54   :  { %500 = vmatprep.subr.bf16.mxu0 %v499_v11  ;;  %v555_v3 = vpack.c.bf16 %v235_v1, %v233_v0  ;;  %v237_v6 = vld [vmem:[#allocation7 + $0x1c8] sm:$0xff]  ;;  %v239_v7 = vld [vmem:[#allocation7 + $0x1d8] sm:$0xff]  ;;  %v236_v10 = vld [vmem:[#allocation7 + $0x1c0] sm:$0xff] }
  0x55   :  { %v559_v9 = vpack.c.bf16 %v239_v7, %v237_v6  ;;  %v238_v11 = vld [vmem:[#allocation7 + $0x1d0] sm:$0xff]  ;;  %v241_v13 = vld [vmem:[#allocation7 + $0x1e8] sm:$0xff]  ;;  %v243_v14 = vld [vmem:[#allocation7 + $0x1f8] sm:$0xff] }
  0x56   :  { %526 = vmatpush1.bf16.msra.mxu1 %v858_v24  ;;  %v561_v12 = vpack.c.bf16 %v238_v11, %v236_v10  ;;  %v242_v17 = vld [vmem:[#allocation7 + $0x1f0] sm:$0xff]  ;;  %v97_v22 = vld [vmem:[%s917_s2] sm:$0x3] }
  0x57   :  { %502 = vmatpush1.bf16.msra.mxu0 %v501_v16  ;;  %528 = vmatprep.subr.bf16.mxu1 %v861_v25  ;;  %v240_v16 = vld [vmem:[#allocation7 + $0x1e0] sm:$0xff] }
  0x58   :  { %568 = vmatprep.subr.bf16.mxu0 %v826_v32  ;;  %v873_v32 = vpack.c.bf16 %v210_v34, %v208_v33 }
  0x5a   :  { %174 = vmatmul.mubr.f32.vlgmr.msra.gmra.mrb[0].mxu0 %v64_v23  ;;  %530 = vmatpush1.bf16.msra.mxu1 %v865_v30  ;;  %v101_v23 = vsub.s32 0, %v100_v20 }
  0x5b   :  { %570 = vmatpush1.bf16.msra.mxu0 %v828_v37  ;;  %532 = vmatprep.subr.bf16.mxu1 %v868_v31  ;;  %v537_v37 = vpack.c.bf16 %v214_v41, %v212_v40 }
  0x5c   :  { %572 = vmatprep.subr.bf16.mxu0 %v830_v38  ;;  %v539_v38 = vpack.c.bf16 %v219_v43, %v217_v42  ;;  %v394_v42 = vld [vmem:[%s918_s3] sm:$0x3]  ;;  %s748_s3 = smov [#allocation8]  }
  0x5d   :  { %v408_v43 = vld [vmem:[%s919_s4] sm:$0x3]  ;;  %s459_s4 = sshll.u32 %s748_s3, 4  ;;  %s460_s4 = int_to_ptr.vmem [resolvable:$true] %s459_s4 }
  0x5e   :  { %534 = vmatpush1.bf16.msra.mxu1 %v873_v32  ;;  %v413_v47 = vrot.slane %v408_v43, %v101_v23  ;;  %s713_s14 = scalar_lea.vmem %s460_s4, 32  ;;  %p718_p11 = scmp.lt.s32.totalorder %s460_s4, %s460_s4 }
  0x5f   :  { %574 = vmatpush1.bf16.msra.mxu0 %v834_v45  ;;  %536 = vmatprep.subr.bf16.mxu1 %v876_v39  ;;  %v541_v45 = vpack.c.bf16 %v218_v46, %v216_v44  ;;  %v403_v44 = vrot.slane %v394_v42, %v105_v21  ;;  %p714_p10 = scmp.ne.s32.totalorder %s460_s4, %s713_s14  ;;  %p719_p12 = scmp.lt.s32.totalorder %s713_s14, %s713_s14 }
  0x60   :  { %576 = vmatprep.subr.bf16.mxu0 %v837_v48  ;;  %v222_v48 = vld [vmem:[#allocation7 + $0x150] sm:$0xff] }
  0x61   :  { %v545_v54 = vpack.c.bf16 %v222_v48, %v220_v51  ;;  %p720_p13 = por %p719_p12, %p718_p11 }
  0x62   :  { %538 = vmatpush1.bf16.msra.mxu1 %v537_v37 }
  0x63   :  { %578 = vmatpush1.bf16.msra.mxu0 %v840_v57  ;;  %540 = vmatprep.subr.bf16.mxu1 %v539_v38  ;;  %v226_v57 = vld [vmem:[#allocation7 + $0x170] sm:$0xff]  ;;  %p721_p0 = pnand %p720_p13, %p714_p10 }
  0x64   :  { %580 = vmatprep.subr.bf16.mxu0 %v843_v60  ;;  %v549_v60 = vpack.c.bf16 %v226_v57, %v224_v56  ;;  %v747_v56 = vmov 1966171168  }
  0x65   :  { %v438_v57 = vunpack.c.l.s4 %v747_v56 }
  0x66   :  { %542 = vmatpush1.bf16.msra.mxu1 %v541_v45 }
  0x67   :  { %582 = vmatpush1.bf16.msra.mxu0 %v846_v5  ;;  %544 = vmatprep.subr.bf16.mxu1 %v543_v50  ;;  %v234_v5 = vld [vmem:[#allocation7 + $0x1b0] sm:$0xff]  ;;  %v439_v59 = vunpack.c.0.s8 %v438_v57 }
  0x68   :  { %584 = vmatprep.subr.bf16.mxu0 %v849_v8  ;;  %v557_v8 = vpack.c.bf16 %v234_v5, %v232_v4 }
  0x6a   :  { %546 = vmatpush1.bf16.msra.mxu1 %v545_v54 }
  0x6b   :  { %586 = vmatpush1.bf16.msra.mxu0 %v852_v15  ;;  %548 = vmatprep.subr.bf16.mxu1 %v547_v55  ;;  %v563_v15 = vpack.c.bf16 %v243_v14, %v241_v13 }
  0x6c   :  { %588 = vmatprep.subr.bf16.mxu0 %v855_v18  ;;  %v565_v18 = vpack.c.bf16 %v242_v17, %v240_v16 }
  0x6e   :  { %550 = vmatpush1.bf16.msra.mxu1 %v549_v60 }
  0x6f   :  { %590 = vmatpush1.bf16.msra.mxu0 %v858_v24  ;;  %552 = vmatprep.subr.bf16.mxu1 %v551_v61  ;;  %v106_v24 = vrot.slane %v97_v22, %v105_v21 }
  0x70   :  { %592 = vmatprep.subr.bf16.mxu0 %v861_v25  ;;  %v102_v25 = vrot.slane %v97_v22, %v101_v23 }
  0x72   :  { %554 = vmatpush1.bf16.msra.mxu1 %v553_v2 }
  0x73   :  { %594 = vmatpush1.bf16.msra.mxu0 %v865_v30  ;;  %556 = vmatprep.subr.bf16.mxu1 %v555_v3 }
  0x74   :  { %596 = vmatprep.subr.bf16.mxu0 %v868_v31 }
  0x76   :  { %558 = vmatpush1.bf16.msra.mxu1 %v557_v8 }
  0x77   :  { %598 = vmatpush1.bf16.msra.mxu0 %v873_v32  ;;  %560 = vmatprep.subr.bf16.mxu1 %v559_v9 }
  0x78   :  { %600 = vmatprep.subr.bf16.mxu0 %v876_v39 }
  0x7a   :  { %562 = vmatpush1.bf16.msra.mxu1 %v561_v12 }
  0x7b   :  { %602 = vmatpush1.bf16.msra.mxu0 %v537_v37  ;;  %564 = vmatprep.subr.bf16.mxu1 %v563_v15  ;;  %v399_v37 = vrot.slane %v394_v42, %v101_v23 }
  0x7c   :  { %604 = vmatprep.subr.bf16.mxu0 %v539_v38 }
  0x7e   :  { %566 = vmatpush1.bf16.msra.mxu1 %v565_v18 }
  0x7f   :  { %606 = vmatpush1.bf16.msra.mxu0 %v541_v45  ;;  %v417_v45 = vrot.slane %v408_v43, %v105_v21 }
  0x80   :  { %608 = vmatprep.subr.bf16.mxu0 %v543_v50 }
  0x83   :  { %610 = vmatpush1.bf16.msra.mxu0 %v545_v54 }
  0x84   :  { %612 = vmatprep.subr.bf16.mxu0 %v547_v55 }
  0x87   :  { %614 = vmatpush1.bf16.msra.mxu0 %v549_v60 }
  0x88   :  { %616 = vmatprep.subr.bf16.mxu0 %v551_v61 }
  0x8b   :  { %618 = vmatpush1.bf16.msra.mxu0 %v553_v2 }
  0x8c   :  { %620 = vmatprep.subr.bf16.mxu0 %v555_v3  ;;  %v442_v3 = vsub.s32 %v439_v59, %v100_v20 }
  0x8f   :  { %622 = vmatpush1.bf16.msra.mxu0 %v557_v8 }
  0x90   :  { %624 = vmatprep.subr.bf16.mxu0 %v559_v9 }
  0x93   :  { %626 = vmatpush1.bf16.msra.mxu0 %v561_v12 }
  0x94   :  { %628 = vmatprep.subr.bf16.mxu0 %v563_v15 }
  0x97   :  { %630 = vmatpush1.bf16.msra.mxu0 %v565_v18 }
 0x12d   :  { %v175_v26 = vpop.f32.mrb[0].mxu0 }
 0x12e   :  { %v177_v27 = vpop.f32.mrb[1].mxu0  ;;  %v176_v29 = vadd.f32 %v175_v26, %v102_v25 }
 0x12f   :  { %v178_v28 = vadd.f32 %v177_v27, %v106_v24 }
 0x131   :  { %308 = vmatprep.mubr.f32.mxu1 %v178_v28 }
 0x132   :  { %309 = vmatmul.mubr.f32.vlgmr.msra.gmra.mrb[0].mxu1 %v176_v29 }
 0x205   :  { %v310_v30 = vpop.f32.mrb[0].mxu1 }
 0x206   :  { %v315_v31 = vsub.f32 %v176_v29, %v310_v30  ;;  %v312_v33 = vpop.f32.mrb[1].mxu1 }
 0x207   :  { %v316_v34 = vsub.f32 %v178_v28, %v312_v33 }
 0x208   :  { %v317_v36 = vmul.f32 %v315_v31, %v315_v31 }
 0x209   :  { %v318_v35 = vmul.f32 %v316_v34, %v316_v34 }
 0x20b   :  { %383 = vmatprep.mubr.f32.mxu0 %v318_v35 }
 0x20c   :  { %384 = vmatmul.mubr.f32.vlgmr.msra.gmra.mrb[2].mxu0 %v317_v36 }
 0x2df   :  { %v385_v32 = vpop.f32.mrb[2].mxu0 }
 0x2e0   :  { %v386_v39 = vadd.f32 1e-06, %v385_v32  ;;  %v387_v40 = vpop.f32.mrb[3].mxu0 }
 0x2e1   :  { %v388_v41 = vadd.f32 1e-06, %v387_v40 }
 0x2e2   :  { %639 = vrsqrt.f32 %v386_v39 }
 0x2e3   :  { %641 = vrsqrt.f32 %v388_v41 }
 0x2ec   :  { %v640_v38 = vpop.eup %639 }
 0x2ed   :  { %v642_v46 = vpop.eup %641  ;;  %v392_v49 = vmul.f32 %v640_v38, %v315_v31 }
 0x2ee   :  { %v393_v50 = vmul.f32 %v642_v46, %v316_v34 }
 0x2ef   :  { %v406_v51 = vmul.f32 %v399_v37, %v392_v49 }
 0x2f0   :  { %v407_v48 = vmul.f32 %v403_v44, %v393_v50 }
 0x2f1   :  { %v420_v52 = vadd.f32 %v413_v47, %v406_v51 }
 0x2f2   :  { %v421_v53 = vadd.f32 %v417_v45, %v407_v48 }
 0x2f3   :  { %v424_v54 = vmul.f32 0.70710677, %v420_v52  ;;  %v422_v61 = vmul.f32 0.5, %v420_v52 }
 0x2f4   :  { %v425_v55 = vmul.f32 0.70710677, %v421_v53  ;;  %v423_v63 = vmul.f32 0.5, %v421_v53 }
 0x2f5   :  { %643 = verf.f32 %v424_v54 }
 0x2f6   :  { %645 = verf.f32 %v425_v55 }
 0x2ff   :  { %v644_v58 = vpop.eup %643 }
 0x300   :  { %v646_v60 = vpop.eup %645  ;;  %v428_v62 = vadd.f32 1.0, %v644_v58 }
 0x301   :  { %v429_v0 = vadd.f32 1.0, %v646_v60 }
 0x302   :  { %v430_v1 = vmul.f32 %v428_v62, %v422_v61 }
 0x303   :  { %v431_v2 = vmul.f32 %v429_v0, %v423_v63 }
 0x305   :  { %v469_v4 = vpack.c.bf16 %v431_v2, %v430_v1 }
 0x307   :  { %v443_v5 = vrot.slane %v469_v4, %v442_v3 }
 0x309   :  { %470 = vst.sshfl [vmem:[#allocation8] sm:$0x5 pattern:$0x73625140] %v443_v5 }
 0x30a   :  { %724 = shalt.err (!%p721_p0)
}
 0x30b   :  { %s725_s17 = scalar_lea.hbm %s921_s6, 32 }
 0x30c   :  { %p726_p1 = scmp.ne.s32.totalorder %s921_s6, %s725_s17  ;;  %p729_p2 = scmp.lt.u32.totalorder %s725_s17, %s921_s6 }
 0x30e   :  { %p731_p3 = pnand %p729_p2, %p726_p1 }
 0x310   :  { %734 = shalt.err (!%p731_p3)
}
 0x311   :  { %462 = dma.vmem_to_hbm [thread:$0]  %s460_s4, 32, %s921_s6, [#allocation4]  }
 0x312   :  { %739 = dma.done.wait [#allocation4], 32  }
 0x313   :  { %740 = vsyncadd [#allocation4], 4294967264 }
 0x314   :  { %466 = vsyncpa [#allocation3], 1 }
 0x315   :  { %467 = vsyncpa [#allocation6], 1 }
 0x316   :  { %468 = vsyncpa [#allocation4], 1 }

</bundles_post_ra>
